<compile_context>
chip_gen: v6e
topology: v6e:2x2x1
jax: 0.10.0
libtpu: 0.0.40
codegen_flags: <defaults>
</compile_context>

<pallas_src>
import math
import functools

import jax
import jax.numpy as jnp
from jax import lax
from jax.experimental import pallas as pl
from jax.experimental.pallas import tpu as pltpu  # noqa: F401  (TPU backend)


# dot_general dimension_numbers with the head axis as batch dim 0:
#   contract the LAST axis of both operands  ("x @ W^T" / "q @ k^T" style)
_DN_B_LAST_LAST = (((2,), (2,)), ((0,), (0,)))
#   standard batched matmul (lhs last axis with rhs second-to-last axis)
_DN_B_STD = (((2,), (1,)), ((0,), (0,)))


def _mha_kernel(x_ref, wq_ref, wk_ref, wv_ref, wfc_ref, y_ref, attn_ref,
                *, inv_sqrt_d_k):
    """Fused multi-head attention, single invocation, all-f32.

    x_ref   : (S, F)        input sequence
    wq/wk/wv: (H, d_k, F)   per-head nn.Linear weights (out = x @ W^T)
    wfc_ref : (H, d_k, F)   fc weight, wfc_ref[h, d, o] == Wfc[o, h*d_k + d]
    y_ref   : (S, F)        fc output
    attn_ref: (H, S, S)     per-head attention probabilities
    """
    H, d_k, F = wq_ref.shape
    S = x_ref.shape[0]

    x = x_ref[...]                                       # (S, F) f32
    # Hoisted once; feeds all three batched projections (cheap major-dim copy).
    xh = jnp.broadcast_to(x[None, :, :], (H, S, F))      # (H, S, F)

    # Batched per-head projections: contract the feature axis, f32 accumulate.
    q = lax.dot_general(xh, wq_ref[...], _DN_B_LAST_LAST,
                        preferred_element_type=jnp.float32)      # (H, S, d_k)
    k = lax.dot_general(xh, wk_ref[...], _DN_B_LAST_LAST,
                        preferred_element_type=jnp.float32)      # (H, S, d_k)
    v = lax.dot_general(xh, wv_ref[...], _DN_B_LAST_LAST,
                        preferred_element_type=jnp.float32)      # (H, S, d_k)

    # Fold the 1/sqrt(d_k) scale into q (smaller than scaling the score matrix).
    q = q * inv_sqrt_d_k

    # Scores: (H, S, S), contraction over d_k (last-last, batched).
    scores = lax.dot_general(q, k, _DN_B_LAST_LAST,
                             preferred_element_type=jnp.float32)
    scores = scores - jnp.max(scores, axis=-1, keepdims=True)
    e = jnp.exp(scores)
    # Exact reciprocal: attn is an exposed output and rows must sum to ~1.
    attn = e / jnp.sum(e, axis=-1, keepdims=True)
    attn_ref[...] = attn.astype(attn_ref.dtype)          # single consolidated store

    # Context: (H, S, d_k), standard batched matmul.
    ctx = lax.dot_general(attn, v, _DN_B_STD,
                          preferred_element_type=jnp.float32)

    # fc projection as per-head partial products, accumulated over heads
    # (no lane-axis concat, no extra rounding step).
    yh = lax.dot_general(ctx, wfc_ref[...], _DN_B_STD,
                         preferred_element_type=jnp.float32)     # (H, S, F)
    y_ref[...] = jnp.sum(yh, axis=0).astype(y_ref.dtype)


def multi_head_attention(x, wq, wk, wv, wfc, *, num_head):
    """x: (1, S, F); wq/wk/wv/wfc: (F, F) in PyTorch nn.Linear weight layout."""
    B, S, F = x.shape
    assert B == 1, "module semantics are batch=1 (view(1, seq_len, ...))"
    d_k = F // num_head
    inv_sqrt_d_k = 1.0 / math.sqrt(d_k)

    # Per-head weight layouts, produced outside the kernel (contiguous reshapes
    # plus one tiny transpose for wfc — XLA handles these off the kernel path).
    wq_h = wq.reshape(num_head, d_k, F)
    wk_h = wk.reshape(num_head, d_k, F)
    wv_h = wv.reshape(num_head, d_k, F)
    wfc_h = wfc.T.reshape(num_head, d_k, F)   # wfc_h[h, d, o] = Wfc[o, h*d_k + d]

    kernel = functools.partial(_mha_kernel, inv_sqrt_d_k=inv_sqrt_d_k)

    flops = (3 * 2 * S * F * F                    # q / k / v projections
             + 2 * 2 * num_head * S * S * d_k     # scores + context
             + 2 * S * F * F)                     # output projection
    bytes_accessed = 4 * (S * F                   # x
                          + 4 * F * F             # four weights
                          + S * F                 # y
                          + num_head * S * S)     # attn

    y2, attn = pl.pallas_call(
        kernel,
        out_shape=(
            jax.ShapeDtypeStruct((S, F), jnp.float32),
            jax.ShapeDtypeStruct((num_head, S, S), jnp.float32),
        ),
        grid=(1,),
        in_specs=[
            pl.BlockSpec((S, F), lambda i: (0, 0)),                     # x
            pl.BlockSpec((num_head, d_k, F), lambda i: (0, 0, 0)),      # Wq
            pl.BlockSpec((num_head, d_k, F), lambda i: (0, 0, 0)),      # Wk
            pl.BlockSpec((num_head, d_k, F), lambda i: (0, 0, 0)),      # Wv
            pl.BlockSpec((num_head, d_k, F), lambda i: (0, 0, 0)),      # Wfc
        ],
        out_specs=(
            pl.BlockSpec((S, F), lambda i: (0, 0)),                     # y
            pl.BlockSpec((num_head, S, S), lambda i: (0, 0, 0)),        # attn
        ),
        cost_estimate=pl.CostEstimate(
            flops=flops,
            transcendentals=num_head * S * S,
            bytes_accessed=bytes_accessed,
        ),
    )(x[0], wq_h, wk_h, wv_h, wfc_h)

    return y2[None], attn


def _reference(x, wq, wk, wv, wfc, *, num_head):
    """Pure-JAX f32 reference mirroring the PyTorch forward (dropout = identity)."""
    _, S, F = x.shape
    d_k = F // num_head
    Q = x[0] @ wq.T
    K = x[0] @ wk.T
    V = x[0] @ wv.T
    Q = Q.reshape(S, num_head, d_k).transpose(1, 0, 2)
    K = K.reshape(S, num_head, d_k).transpose(1, 0, 2)
    V = V.reshape(S, num_head, d_k).transpose(1, 0, 2)
    scores = jnp.einsum("hqd,hkd->hqk", Q, K) / math.sqrt(d_k)
    attn = jax.nn.softmax(scores, axis=-1)
    y = jnp.einsum("hqk,hkd->hqd", attn, V)
    y = y.transpose(1, 0, 2).reshape(1, S, F)
    y = y @ wfc.T
    return y, attn


if __name__ == "__main__":
    # Small deterministic configuration consistent with the module:
    # num_head=4, num_feature=32, seq_len=8, batch=1.
    num_head = 4
    num_feature = 32
    seq_len = 8

    key = jax.random.PRNGKey(0)
    kx, kq, kk, kv, kf = jax.random.split(key, 5)
    x = jax.random.normal(kx, (1, seq_len, num_feature), dtype=jnp.float32)
    scale = 1.0 / math.sqrt(num_feature)
    wq = jax.random.uniform(kq, (num_feature, num_feature), jnp.float32, -scale, scale)
    wk = jax.random.uniform(kk, (num_feature, num_feature), jnp.float32, -scale, scale)
    wv = jax.random.uniform(kv, (num_feature, num_feature), jnp.float32, -scale, scale)
    wfc = jax.random.uniform(kf, (num_feature, num_feature), jnp.float32, -scale, scale)

    y, attn = multi_head_attention(x, wq, wk, wv, wfc, num_head=num_head)
    jax.block_until_ready((y, attn))

    y_ref, attn_ref = _reference(x, wq, wk, wv, wfc, num_head=num_head)
    assert y.shape == (1, seq_len, num_feature)
    assert attn.shape == (num_head, seq_len, seq_len)
    assert jnp.allclose(attn, attn_ref, atol=1e-2, rtol=1e-2), (
        float(jnp.max(jnp.abs(attn - attn_ref))))
    assert jnp.allclose(y, y_ref, atol=1e-2, rtol=1e-2), (
        float(jnp.max(jnp.abs(y - y_ref))))

    print("KERNEL_OK")
</pallas_src>

<mosaic_0001>
module attributes {stable_mosaic.version = 11 : i64} {
  func.func @_mha_kernel(%arg0: i32, %arg1: memref<8x32xf32, #tpu.memory_space<vmem>>, %arg2: memref<4x8x32xf32, #tpu.memory_space<vmem>>, %arg3: memref<4x8x32xf32, #tpu.memory_space<vmem>>, %arg4: memref<4x8x32xf32, #tpu.memory_space<vmem>>, %arg5: memref<4x8x32xf32, #tpu.memory_space<vmem>>, %arg6: memref<8x32xf32, #tpu.memory_space<vmem>>, %arg7: memref<4x8x8xf32, #tpu.memory_space<vmem>>) attributes {dimension_semantics = [#tpu.dimension_semantics<arbitrary>], iteration_bounds = array<i64: 1>, scalar_prefetch = 0 : i64, scratch_operands = 0 : i64, tpu.core_type = #tpu.core_type<tc>, window_params = [{pipeline_mode = #tpu.pipeline_mode<synchronous>, transform_indices = @transform_0, window_bounds = array<i64: 8, 32>}, {pipeline_mode = #tpu.pipeline_mode<synchronous>, transform_indices = @transform_1, window_bounds = array<i64: 4, 8, 32>}, {pipeline_mode = #tpu.pipeline_mode<synchronous>, transform_indices = @transform_2, window_bounds = array<i64: 4, 8, 32>}, {pipeline_mode = #tpu.pipeline_mode<synchronous>, transform_indices = @transform_3, window_bounds = array<i64: 4, 8, 32>}, {pipeline_mode = #tpu.pipeline_mode<synchronous>, transform_indices = @transform_4, window_bounds = array<i64: 4, 8, 32>}, {pipeline_mode = #tpu.pipeline_mode<synchronous>, transform_indices = @transform_5, window_bounds = array<i64: 8, 32>}, {pipeline_mode = #tpu.pipeline_mode<synchronous>, transform_indices = @transform_6, window_bounds = array<i64: 4, 8, 8>}]} {
    %c0 = arith.constant 0 : index
    %c0_0 = arith.constant 0 : index
    %0 = vector.load %arg1[%c0, %c0_0] : memref<8x32xf32, #tpu.memory_space<vmem>>, vector<8x32xf32>
    %1 = vector.shape_cast %0 : vector<8x32xf32> to vector<1x8x32xf32>
    %2 = vector.shape_cast %1 : vector<1x8x32xf32> to vector<1x8x32xf32>
    %3 = vector.broadcast %2 : vector<1x8x32xf32> to vector<4x8x32xf32>
    %c0_1 = arith.constant 0 : index
    %c0_2 = arith.constant 0 : index
    %c0_3 = arith.constant 0 : index
    %4 = vector.load %arg2[%c0_1, %c0_2, %c0_3] : memref<4x8x32xf32, #tpu.memory_space<vmem>>, vector<4x8x32xf32>
    %cst = arith.constant dense<0.000000e+00> : vector<4x8x8xf32>
    %5 = tpu.matmul %3, %4, %cst {dimension_numbers = #tpu.dot_dimension_numbers<[2], [2], [1], [1], [0, 0, 0, 1, 1, 1], [0], [0]>} : vector<4x8x32xf32>, vector<4x8x32xf32>, vector<4x8x8xf32> -> vector<4x8x8xf32>
    %c0_4 = arith.constant 0 : index
    %c0_5 = arith.constant 0 : index
    %c0_6 = arith.constant 0 : index
    %6 = vector.load %arg3[%c0_4, %c0_5, %c0_6] : memref<4x8x32xf32, #tpu.memory_space<vmem>>, vector<4x8x32xf32>
    %cst_7 = arith.constant dense<0.000000e+00> : vector<4x8x8xf32>
    %7 = tpu.matmul %3, %6, %cst_7 {dimension_numbers = #tpu.dot_dimension_numbers<[2], [2], [1], [1], [0, 0, 0, 1, 1, 1], [0], [0]>} : vector<4x8x32xf32>, vector<4x8x32xf32>, vector<4x8x8xf32> -> vector<4x8x8xf32>
    %c0_8 = arith.constant 0 : index
    %c0_9 = arith.constant 0 : index
    %c0_10 = arith.constant 0 : index
    %8 = vector.load %arg4[%c0_8, %c0_9, %c0_10] : memref<4x8x32xf32, #tpu.memory_space<vmem>>, vector<4x8x32xf32>
    %cst_11 = arith.constant dense<0.000000e+00> : vector<4x8x8xf32>
    %9 = tpu.matmul %3, %8, %cst_11 {dimension_numbers = #tpu.dot_dimension_numbers<[2], [2], [1], [1], [0, 0, 0, 1, 1, 1], [0], [0]>} : vector<4x8x32xf32>, vector<4x8x32xf32>, vector<4x8x8xf32> -> vector<4x8x8xf32>
    %cst_12 = arith.constant 0.353553385 : f32
    %10 = vector.broadcast %cst_12 : f32 to vector<4x8x8xf32>
    %11 = arith.mulf %5, %10 : vector<4x8x8xf32>
    %cst_13 = arith.constant dense<0.000000e+00> : vector<4x8x8xf32>
    %12 = tpu.matmul %11, %7, %cst_13 {dimension_numbers = #tpu.dot_dimension_numbers<[2], [2], [1], [1], [0, 0, 0, 1, 1, 1], [0], [0]>} : vector<4x8x8xf32>, vector<4x8x8xf32>, vector<4x8x8xf32> -> vector<4x8x8xf32>
    %cst_14 = arith.constant dense<0xFF800000> : vector<4x8xf32>
    %13 = vector.multi_reduction <maximumf>, %12, %cst_14 [2] : vector<4x8x8xf32> to vector<4x8xf32>
    %14 = vector.shape_cast %13 : vector<4x8xf32> to vector<4x8x1xf32>
    %15 = vector.broadcast %14 : vector<4x8x1xf32> to vector<4x8x8xf32>
    %16 = arith.subf %12, %15 : vector<4x8x8xf32>
    %17 = math.exp %16 : vector<4x8x8xf32>
    %cst_15 = arith.constant dense<0.000000e+00> : vector<4x8xf32>
    %18 = vector.multi_reduction <add>, %17, %cst_15 [2] : vector<4x8x8xf32> to vector<4x8xf32>
    %19 = vector.shape_cast %18 : vector<4x8xf32> to vector<4x8x1xf32>
    %20 = vector.broadcast %19 : vector<4x8x1xf32> to vector<4x8x8xf32>
    %21 = arith.divf %17, %20 : vector<4x8x8xf32>
    %c0_16 = arith.constant 0 : index
    %c0_17 = arith.constant 0 : index
    %c0_18 = arith.constant 0 : index
    %22 = vector.load %arg7[%c0_16, %c0_17, %c0_18] : memref<4x8x8xf32, #tpu.memory_space<vmem>>, vector<4x8x8xf32>
    tpu.vector_store %arg7[%c0_16, %c0_17, %c0_18], %21 {strides = array<i32>} : memref<4x8x8xf32, #tpu.memory_space<vmem>>, vector<4x8x8xf32>,
    %cst_19 = arith.constant dense<0.000000e+00> : vector<4x8x8xf32>
    %23 = tpu.matmul %21, %9, %cst_19 {dimension_numbers = #tpu.dot_dimension_numbers<[2], [1], [1], [2], [0, 0, 0, 1, 1, 2], [0], [0]>} : vector<4x8x8xf32>, vector<4x8x8xf32>, vector<4x8x8xf32> -> vector<4x8x8xf32>
    %c0_20 = arith.constant 0 : index
    %c0_21 = arith.constant 0 : index
    %c0_22 = arith.constant 0 : index
    %24 = vector.load %arg5[%c0_20, %c0_21, %c0_22] : memref<4x8x32xf32, #tpu.memory_space<vmem>>, vector<4x8x32xf32>
    %cst_23 = arith.constant dense<0.000000e+00> : vector<4x8x32xf32>
    %25 = tpu.matmul %23, %24, %cst_23 {dimension_numbers = #tpu.dot_dimension_numbers<[2], [1], [1], [2], [0, 0, 0, 1, 1, 2], [0], [0]>} : vector<4x8x8xf32>, vector<4x8x32xf32>, vector<4x8x32xf32> -> vector<4x8x32xf32>
    %cst_24 = arith.constant dense<0.000000e+00> : vector<8x32xf32>
    %26 = vector.multi_reduction <add>, %25, %cst_24 [0] : vector<4x8x32xf32> to vector<8x32xf32>
    %c0_25 = arith.constant 0 : index
    %c0_26 = arith.constant 0 : index
    %27 = vector.load %arg6[%c0_25, %c0_26] : memref<8x32xf32, #tpu.memory_space<vmem>>, vector<8x32xf32>
    tpu.vector_store %arg6[%c0_25, %c0_26], %26 {strides = array<i32>} : memref<8x32xf32, #tpu.memory_space<vmem>>, vector<8x32xf32>,
    return
  }
  func.func @transform_0(%arg0: i32) -> (i32, i32) {
    %c0_i32 = arith.constant 0 : i32
    %c0_i32_0 = arith.constant 0 : i32
    %c0_i32_1 = arith.constant 0 : i32
    return %c0_i32, %c0_i32_0 : i32, i32
  }
  func.func @transform_1(%arg0: i32) -> (i32, i32, i32) {
    %c0_i32 = arith.constant 0 : i32
    %c0_i32_0 = arith.constant 0 : i32
    %c0_i32_1 = arith.constant 0 : i32
    %c0_i32_2 = arith.constant 0 : i32
    return %c0_i32, %c0_i32_0, %c0_i32_1 : i32, i32, i32
  }
  func.func @transform_2(%arg0: i32) -> (i32, i32, i32) {
    %c0_i32 = arith.constant 0 : i32
    %c0_i32_0 = arith.constant 0 : i32
    %c0_i32_1 = arith.constant 0 : i32
    %c0_i32_2 = arith.constant 0 : i32
    return %c0_i32, %c0_i32_0, %c0_i32_1 : i32, i32, i32
  }
  func.func @transform_3(%arg0: i32) -> (i32, i32, i32) {
    %c0_i32 = arith.constant 0 : i32
    %c0_i32_0 = arith.constant 0 : i32
    %c0_i32_1 = arith.constant 0 : i32
    %c0_i32_2 = arith.constant 0 : i32
    return %c0_i32, %c0_i32_0, %c0_i32_1 : i32, i32, i32
  }
  func.func @transform_4(%arg0: i32) -> (i32, i32, i32) {
    %c0_i32 = arith.constant 0 : i32
    %c0_i32_0 = arith.constant 0 : i32
    %c0_i32_1 = arith.constant 0 : i32
    %c0_i32_2 = arith.constant 0 : i32
    return %c0_i32, %c0_i32_0, %c0_i32_1 : i32, i32, i32
  }
  func.func @transform_5(%arg0: i32) -> (i32, i32) {
    %c0_i32 = arith.constant 0 : i32
    %c0_i32_0 = arith.constant 0 : i32
    %c0_i32_1 = arith.constant 0 : i32
    return %c0_i32, %c0_i32_0 : i32, i32
  }
  func.func @transform_6(%arg0: i32) -> (i32, i32, i32) {
    %c0_i32 = arith.constant 0 : i32
    %c0_i32_0 = arith.constant 0 : i32
    %c0_i32_1 = arith.constant 0 : i32
    %c0_i32_2 = arith.constant 0 : i32
    return %c0_i32, %c0_i32_0, %c0_i32_1 : i32, i32, i32
  }
}

</mosaic_0001>

<bundles_post_ra>
// kernel: tpu_custom_call.1
= control target key start
LH: loop header
LB: loop body
LE: loop exit
PB: predicated region body
PF: predicated region fallthrough
CT: control target
= control target key end

     0   :  { %12 = vsyncpa [#allocation3], 0  ;;  %s2568_s0 = inlined_call_operand.hbm [shape: f32[8,32], index: 0, kind: input, shape index: {}]   ;;  %s2569_s1 = inlined_call_operand.hbm [shape: f32[4,8,32], index: 1, kind: input, shape index: {}]   ;;  %s2570_s2 = inlined_call_operand.hbm [shape: f32[4,8,32], index: 2, kind: input, shape index: {}]   ;;  %s2571_s3 = inlined_call_operand.hbm [shape: f32[4,8,32], index: 3, kind: input, shape index: {}]   ;;  %s2572_s4 = inlined_call_operand.hbm [shape: f32[4,8,32], index: 4, kind: input, shape index: {}]   ;;  %s2573_s5 = inlined_call_operand.hbm [shape: f32[8,32], index: 5, kind: output, shape index: {0}]   ;;  %s2574_s6 = inlined_call_operand.hbm [shape: f32[4,8,8], index: 6, kind: output, shape index: {1}]  }
   0x1   :  { %13 = vsyncpa [#allocation6], 0 }
   0x2   :  { %14 = vsyncpa [#allocation9], 0 }
   0x3   :  { %15 = vsyncpa [#allocation4], 0 }
   0x4   :  { %16 = vsyncpa [#allocation13], 0  ;;  %s2354_s21 = smov [#allocation5]  }
   0x5   :  { %s32_s22 = sshll.u32 %s2354_s21, 4  ;;  %s33_s22 = int_to_ptr.vmem [resolvable:$true] %s32_s22 }
   0x6   :  { %s2212_s23 = scalar_lea.vmem %s33_s22, 512  ;;  %p2217_p1 = scmp.lt.s32.totalorder %s33_s22, %s33_s22 }
   0x7   :  { %p2213_p0 = scmp.ne.s32.totalorder %s33_s22, %s2212_s23  ;;  %p2218_p2 = scmp.lt.s32.totalorder %s2212_s23, %s2212_s23 }
   0x9   :  { %p2219_p3 = por %p2218_p2, %p2217_p1 }
   0xb   :  { %p2220_p4 = pnand %p2219_p3, %p2213_p0 }
   0xd   :  { %2223 = shalt.err (!%p2220_p4)
}
   0xe   :  { %s2355_s24 = smov 128   ;;  %s2356_s25 = smov 8  }
   0xf   :  { %38 = dma.hbm_to_vmem [thread:$0]  %s2569_s1, 512, %s33_s22, [#allocation6], %s2355_s24, %s2355_s24, %s2356_s25  }
  0x10   :  { %s2357_s28 = smov [#allocation8]   ;;  %s2358_s30 = smov [#allocation2]  }
  0x11   :  { %s56_s29 = sshll.u32 %s2357_s28, 4  ;;  %s23_s7 = sshll.u32 %s2358_s30, 4  ;;  %s57_s29 = int_to_ptr.vmem [resolvable:$true] %s56_s29  ;;  %s24_s7 = int_to_ptr.vmem [resolvable:$true] %s23_s7 }
  0x12   :  { %s2232_s8 = scalar_lea.vmem %s57_s29, 512  ;;  %p2237_p6 = scmp.lt.s32.totalorder %s57_s29, %s57_s29 }
  0x13   :  { %p2233_p5 = scmp.ne.s32.totalorder %s57_s29, %s2232_s8  ;;  %p2238_p7 = scmp.lt.s32.totalorder %s2232_s8, %s2232_s8 }
  0x15   :  { %p2239_p8 = por %p2238_p7, %p2237_p6 }
  0x17   :  { %p2240_p9 = pnand %p2239_p8, %p2233_p5 }
  0x19   :  { %2243 = shalt.err (!%p2240_p9)
}
  0x1a   :  { %62 = dma.hbm_to_vmem [thread:$0]  %s2571_s3, 512, %s57_s29, [#allocation9], %s2355_s24, %s2355_s24, %s2356_s25  }
  0x1b   :  { %s2252_s1 = scalar_lea.vmem %s24_s7, 128  ;;  %p2257_p11 = scmp.lt.s32.totalorder %s24_s7, %s24_s7 }
  0x1c   :  { %p2253_p10 = scmp.ne.s32.totalorder %s24_s7, %s2252_s1  ;;  %p2258_p12 = scmp.lt.s32.totalorder %s2252_s1, %s2252_s1 }
  0x1e   :  { %p2259_p13 = por %p2258_p12, %p2257_p11 }
  0x20   :  { %p2260_p0 = pnand %p2259_p13, %p2253_p10 }
  0x22   :  { %2263 = shalt.err (!%p2260_p0)
}
  0x23   :  { %26 = dma.hbm_to_vmem [thread:$0]  %s2568_s0, 128, %s24_s7, [#allocation3]  }
  0x24   :  { %s2359_s13 = smov [#allocation7]   ;;  %s2360_s15 = smov [#allocation10]  }
  0x25   :  { %s44_s14 = sshll.u32 %s2359_s13, 4  ;;  %s68_s16 = sshll.u32 %s2360_s15, 4  ;;  %s45_s14 = int_to_ptr.vmem [resolvable:$true] %s44_s14  ;;  %s69_s16 = int_to_ptr.vmem [resolvable:$true] %s68_s16 }
  0x26   :  { %s2272_s17 = scalar_lea.vmem %s45_s14, 512  ;;  %p2277_p2 = scmp.lt.s32.totalorder %s45_s14, %s45_s14 }
  0x27   :  { %p2273_p1 = scmp.ne.s32.totalorder %s45_s14, %s2272_s17  ;;  %p2278_p3 = scmp.lt.s32.totalorder %s2272_s17, %s2272_s17 }
  0x29   :  { %p2279_p4 = por %p2278_p3, %p2277_p2 }
  0x2b   :  { %p2280_p5 = pnand %p2279_p4, %p2273_p1 }
  0x2d   :  { %2283 = shalt.err (!%p2280_p5)
}
  0x2e   :  { %50 = dma.hbm_to_vmem [thread:$0]  %s2570_s2, 512, %s45_s14, [#allocation6], %s2355_s24, %s2355_s24, %s2356_s25  }
  0x2f   :  { %s2292_s0 = scalar_lea.vmem %s69_s16, 512  ;;  %p2297_p7 = scmp.lt.s32.totalorder %s69_s16, %s69_s16 }
  0x30   :  { %p2293_p6 = scmp.ne.s32.totalorder %s69_s16, %s2292_s0  ;;  %p2298_p8 = scmp.lt.s32.totalorder %s2292_s0, %s2292_s0 }
  0x32   :  { %p2299_p9 = por %p2298_p8, %p2297_p7 }
  0x34   :  { %p2300_p10 = pnand %p2299_p9, %p2293_p6 }
  0x36   :  { %2303 = shalt.err (!%p2300_p10)
}
  0x37   :  { %74 = dma.hbm_to_vmem [thread:$0]  %s2572_s4, 512, %s69_s16, [#allocation9], %s2355_s24, %s2355_s24, %s2356_s25  }
  0x38   :  { %2344 = dma.done.wait [#allocation3], 128  }
  0x39   :  { %2345 = vsyncadd [#allocation3], 4294967168 }
  0x3a   :  { %2346 = dma.done.wait [#allocation6], 1024  }
  0x3b   :  { %2347 = vsyncadd [#allocation6], 4294966272 }
  0x3c   :  { %2348 = dma.done.wait [#allocation9], 1024  }
  0x3d   :  { %2349 = vsyncadd [#allocation9], 4294966272  ;;  %v2361_v0 = vmov 0.0   ;;  %vm2362_vm0 = vmmov 0   ;;  %vm95_vm1 = vcmask 261120   ;;  %v91_v1 = vld [vmem:[#allocation5] sm:$0xff] }
  0x3e   :  { %2057 = vmatprep.subr.mxu0 %v2361_v0  ;;  %2062 = vmatprep.subr.mxu1 %v2361_v0  ;;  %v92_v2 = vld [vmem:[#allocation5 + $0x8] sm:$0xff]  ;;  %v90_v3 = vld [vmem:[#allocation2] sm:$0xff]  ;;  %v93_v4 = vld [vmem:[#allocation5 + $0x10] sm:$0xff]  ;;  %vm987_vm2 = vcmask 64512   ;;  %s2363_s2 = smov [#allocation12]  }
  0x3f   :  { %2059 = vmatprep.mubr.msk.f32.mxu0 %vm2362_vm0, %v2361_v0  ;;  %2064 = vmatprep.mubr.msk.f32.mxu1 %vm2362_vm0, %v2361_v0  ;;  %v94_v5 = vld [vmem:[#allocation5 + $0x18] sm:$0xff]  ;;  %v391_v6 = vld [vmem:[#allocation7] sm:$0xff]  ;;  %v392_v7 = vld [vmem:[#allocation7 + $0x8] sm:$0xff]  ;;  %s1951_s4 = sshll.u32 %s2363_s2, 4  ;;  %s1952_s4 = int_to_ptr.vmem [resolvable:$true] %s1951_s4 }
  0x40   :  { %2058 = vmatpush3.xpose.msk.msra.mxu0 %vm95_vm1, %v91_v1  ;;  %2063 = vmatpush3.xpose.msk.msra.mxu1 %vm95_vm1, %v92_v2  ;;  %v393_v8 = vld [vmem:[#allocation7 + $0x10] sm:$0xff]  ;;  %v394_v9 = vld [vmem:[#allocation7 + $0x18] sm:$0xff]  ;;  %v687_v10 = vld [vmem:[#allocation8] sm:$0xff]  ;;  %s2304_s21 = scalar_lea.vmem %s1952_s4, 512  ;;  %p2309_p12 = scmp.lt.s32.totalorder %s1952_s4, %s1952_s4 }
  0x41   :  { %2067 = vmatprep.subr.mxu0 %v2361_v0  ;;  %2072 = vmatprep.subr.mxu1 %v2361_v0  ;;  %v688_v11 = vld [vmem:[#allocation8 + $0x8] sm:$0xff]  ;;  %v689_v12 = vld [vmem:[#allocation8 + $0x10] sm:$0xff]  ;;  %v690_v13 = vld [vmem:[#allocation8 + $0x18] sm:$0xff]  ;;  %p2305_p11 = scmp.ne.s32.totalorder %s1952_s4, %s2304_s21  ;;  %p2310_p13 = scmp.lt.s32.totalorder %s2304_s21, %s2304_s21 }
  0x43   :  { %2060 = vmatmul.mubr.msk.f32.vlgmr.msra.gmra.mxu0 %vm95_vm1, %v90_v3  ;;  %2065 = vmatmul.mubr.msk.f32.vlgmr.msra.gmra.mxu1 %vm95_vm1, %v90_v3  ;;  %p2311_p0 = por %p2310_p13, %p2309_p12 }
  0x44   :  { %2068 = vmatpush3.xpose.msk.msra.mxu0 %vm95_vm1, %v93_v4  ;;  %2073 = vmatpush3.xpose.msk.msra.mxu1 %vm95_vm1, %v94_v5 }
  0x45   :  { %2069 = vmatprep.mubr.msk.f32.mxu0 %vm2362_vm0, %v2361_v0  ;;  %2074 = vmatprep.mubr.msk.f32.mxu1 %vm2362_vm0, %v2361_v0  ;;  %p2312_p1 = pnand %p2311_p0, %p2305_p11 }
  0x46   :  { %2077 = vmatprep.subr.mxu0 %v2361_v0  ;;  %2082 = vmatprep.subr.mxu1 %v2361_v0 }
  0x47   :  { %2070 = vmatmul.mubr.msk.f32.vlgmr.msra.gmra.mxu0 %vm95_vm1, %v90_v3  ;;  %2075 = vmatmul.mubr.msk.f32.vlgmr.msra.gmra.mxu1 %vm95_vm1, %v90_v3 }
  0x48   :  { %2078 = vmatpush3.xpose.msk.msra.mxu0 %vm95_vm1, %v391_v6  ;;  %2083 = vmatpush3.xpose.msk.msra.mxu1 %vm95_vm1, %v392_v7 }
  0x49   :  { %2079 = vmatprep.mubr.msk.f32.mxu0 %vm2362_vm0, %v2361_v0  ;;  %2084 = vmatprep.mubr.msk.f32.mxu1 %vm2362_vm0, %v2361_v0 }
  0x4a   :  { %2087 = vmatprep.subr.mxu0 %v2361_v0  ;;  %2092 = vmatprep.subr.mxu1 %v2361_v0 }
  0x4b   :  { %2080 = vmatmul.mubr.msk.f32.vlgmr.msra.gmra.mxu0 %vm95_vm1, %v90_v3  ;;  %2085 = vmatmul.mubr.msk.f32.vlgmr.msra.gmra.mxu1 %vm95_vm1, %v90_v3 }
  0x4c   :  { %2088 = vmatpush3.xpose.msk.msra.mxu0 %vm95_vm1, %v393_v8  ;;  %2093 = vmatpush3.xpose.msk.msra.mxu1 %vm95_vm1, %v394_v9 }
  0x4d   :  { %2089 = vmatprep.mubr.msk.f32.mxu0 %vm2362_vm0, %v2361_v0  ;;  %2094 = vmatprep.mubr.msk.f32.mxu1 %vm2362_vm0, %v2361_v0 }
  0x4e   :  { %2097 = vmatprep.subr.mxu0 %v2361_v0  ;;  %2102 = vmatprep.subr.mxu1 %v2361_v0 }
  0x4f   :  { %2090 = vmatmul.mubr.msk.f32.vlgmr.msra.gmra.mxu0 %vm95_vm1, %v90_v3  ;;  %2095 = vmatmul.mubr.msk.f32.vlgmr.msra.gmra.mxu1 %vm95_vm1, %v90_v3 }
  0x50   :  { %2099 = vmatprep.mubr.msk.f32.mxu0 %vm2362_vm0, %v2361_v0  ;;  %2104 = vmatprep.mubr.msk.f32.mxu1 %vm2362_vm0, %v2361_v0 }
  0x51   :  { %2098 = vmatpush3.xpose.msk.msra.mxu0 %vm95_vm1, %v687_v10  ;;  %2103 = vmatpush3.xpose.msk.msra.mxu1 %vm95_vm1, %v688_v11 }
  0x52   :  { %2107 = vmatprep.subr.mxu0 %v2361_v0  ;;  %2112 = vmatprep.subr.mxu1 %v2361_v0 }
  0x54   :  { %2100 = vmatmul.mubr.msk.f32.vlgmr.msra.gmra.mxu0 %vm95_vm1, %v90_v3  ;;  %2105 = vmatmul.mubr.msk.f32.vlgmr.msra.gmra.mxu1 %vm95_vm1, %v90_v3 }
  0x55   :  { %2108 = vmatpush3.xpose.msk.msra.mxu0 %vm95_vm1, %v689_v12  ;;  %2109 = vmatprep.mubr.msk.f32.mxu0 %vm2362_vm0, %v2361_v0 }
  0x56   :  { %2117 = vmatprep.subr.mxu0 %v2361_v0  ;;  %2113 = vmatpush3.xpose.msk.msra.mxu1 %vm95_vm1, %v690_v13 }
  0x57   :  { %2114 = vmatprep.mubr.msk.f32.mxu1 %vm2362_vm0, %v2361_v0  ;;  %2122 = vmatprep.subr.mxu1 %v2361_v0 }
  0x58   :  { %2110 = vmatmul.mubr.msk.f32.vlgmr.msra.gmra.mxu0 %vm95_vm1, %v90_v3 }
  0x59   :  { %2119 = vmatprep.mubr.msk.f32.mxu0 %vm2362_vm0, %v2361_v0  ;;  %2115 = vmatmul.mubr.msk.f32.vlgmr.msra.gmra.mxu1 %vm95_vm1, %v90_v3 }
  0x5a   :  { %2124 = vmatprep.mubr.msk.f32.mxu1 %vm2362_vm0, %v2361_v0 }
 0x103   :  { %v168_v14 = vpop.f32.mrf.mxu0  ;;  %v241_v15 = vpop.f32.mrf.mxu1 }
 0x104   :  { %v983_v24 = vmul.f32 0.35355338, %v168_v14  ;;  %v984_v25 = vmul.f32 0.35355338, %v241_v15 }
 0x105   :  { %v2061_v16 = vpop.f32.mrf.mxu0  ;;  %v2066_v17 = vpop.f32.mrf.mxu1 }
 0x107   :  { %v314_v18 = vpop.f32.mrf.mxu0  ;;  %v387_v19 = vpop.f32.mrf.mxu1 }
 0x108   :  { %v985_v30 = vmul.f32 0.35355338, %v314_v18  ;;  %v986_v31 = vmul.f32 0.35355338, %v387_v19 }
 0x109   :  { %v2071_v20 = vpop.f32.mrf.mxu0  ;;  %v2076_v21 = vpop.f32.mrf.mxu1 }
 0x10b   :  { %v464_v22 = vpop.f32.mrf.mxu0  ;;  %v537_v23 = vpop.f32.mrf.mxu1 }
 0x10c   :  { %2118 = vmatpush3.xpose.msk.msra.mxu0 %vm987_vm2, %v464_v22  ;;  %2123 = vmatpush3.xpose.msk.msra.mxu1 %vm987_vm2, %v537_v23  ;;  %v1632_v23 = vld [vmem:[#allocation10] sm:$0xff] }
 0x10d   :  { %v2081_v26 = vpop.f32.mrf.mxu0  ;;  %v2086_v27 = vpop.f32.mrf.mxu1  ;;  %2127 = vmatprep.subr.mxu0 %v2361_v0  ;;  %2132 = vmatprep.subr.mxu1 %v2361_v0 }
 0x10f   :  { %v610_v28 = vpop.f32.mrf.mxu0  ;;  %v683_v29 = vpop.f32.mrf.mxu1  ;;  %2120 = vmatmul.mubr.msk.f32.vlgmr.msra.gmra.mxu0 %vm987_vm2, %v983_v24  ;;  %2125 = vmatmul.mubr.msk.f32.vlgmr.msra.gmra.mxu1 %vm987_vm2, %v984_v25  ;;  %v1633_v24 = vld [vmem:[#allocation10 + $0x8] sm:$0xff]  ;;  %v1634_v25 = vld [vmem:[#allocation10 + $0x10] sm:$0xff] }
 0x110   :  { %2128 = vmatpush3.xpose.msk.msra.mxu0 %vm987_vm2, %v610_v28  ;;  %2133 = vmatpush3.xpose.msk.msra.mxu1 %vm987_vm2, %v683_v29  ;;  %v1635_v28 = vld [vmem:[#allocation10 + $0x18] sm:$0xff] }
 0x111   :  { %v2091_v32 = vpop.f32.mrf.mxu0  ;;  %2129 = vmatprep.mubr.msk.f32.mxu0 %vm2362_vm0, %v2361_v0  ;;  %2134 = vmatprep.mubr.msk.f32.mxu1 %vm2362_vm0, %v2361_v0  ;;  %v2096_v33 = vpop.f32.mrf.mxu1 }
 0x112   :  { %2137 = vmatprep.subr.mxu0 %v2361_v0  ;;  %2142 = vmatprep.subr.mxu1 %v2361_v0 }
 0x113   :  { %2130 = vmatmul.mubr.msk.f32.vlgmr.msra.gmra.mxu0 %vm987_vm2, %v985_v30  ;;  %2135 = vmatmul.mubr.msk.f32.vlgmr.msra.gmra.mxu1 %vm987_vm2, %v986_v31 }
 0x114   :  { %2139 = vmatprep.mubr.msk.f32.mxu0 %vm2362_vm0, %v2361_v0  ;;  %2144 = vmatprep.mubr.msk.f32.mxu1 %vm2362_vm0, %v2361_v0  ;;  %v760_v34 = vpop.f32.mrf.mxu0  ;;  %v833_v35 = vpop.f32.mrf.mxu1 }
 0x115   :  { %2138 = vmatpush3.msra.mxu0 %v760_v34  ;;  %2143 = vmatpush3.msra.mxu1 %v833_v35 }
 0x116   :  { %v2101_v36 = vpop.f32.mrf.mxu0  ;;  %2147 = vmatprep.subr.mxu0 %v2361_v0  ;;  %v2106_v37 = vpop.f32.mrf.mxu1  ;;  %2152 = vmatprep.subr.mxu1 %v2361_v0 }
 0x118   :  { %v906_v38 = vpop.f32.mrf.mxu0 }
 0x119   :  { %v2515_v39 = vpop.f32.mrf.mxu1 }
 0x11a   :  { %v2111_v40 = vpop.f32.mrf.mxu0 }
 0x11b   :  { %v2116_v41 = vpop.f32.mrf.mxu1 }
 0x1cf   :  { %v1060_v42 = vpop.f32.mrf.mxu0  ;;  %v1136_v43 = vpop.f32.mrf.mxu1 }
 0x1d0   :  { %v1292_v44 = vsel %vm987_vm2, %v1060_v42, -inf  ;;  %v1295_v49 = vsel %vm987_vm2, %v1136_v43, -inf }
 0x1d1   :  { %v2126_v45 = vpop.f32.mrf.mxu1  ;;  %1293 = vmax.xlane.f32.xlu0 %v1292_v44  ;;  %v2121_v46 = vpop.f32.mrf.mxu0 }
 0x1d3   :  { %v1212_v47 = vpop.f32.mrf.mxu0  ;;  %v1288_v48 = vpop.f32.mrf.mxu1 }
 0x1d4   :  { %v1298_v50 = vsel %vm987_vm2, %v1212_v47, -inf  ;;  %v1301_v53 = vsel %vm987_vm2, %v1288_v48, -inf }
 0x1d5   :  { %v2136_v51 = vpop.f32.mrf.mxu1  ;;  %1296 = vmax.xlane.f32.xlu0 %v1295_v49  ;;  %1299 = vmax.xlane.f32.xlu1 %v1298_v50  ;;  %v2131_v52 = vpop.f32.mrf.mxu0 }
 0x1d9   :  { %1302 = vmax.xlane.f32.xlu1 %v1301_v53 }
 0x25a   :  { %v1294_v54 = vpop.xlane.xlu0 %1293 }
 0x25b   :  { %v1304_v55 = vsub.f32 %v1060_v42, %v1294_v54 }
 0x25d   :  { %v1308_v56 = vmul.f32 1.442695, %v1304_v55 }
 0x25e   :  { %v1297_v57 = vpop.xlane.xlu0 %1296  ;;  %v1300_v58 = vpop.xlane.xlu1 %1299 }
 0x25f   :  { %2188 = vpow2.f32 %v1308_v56  ;;  %v1305_v59 = vsub.f32 %v1136_v43, %v1297_v57  ;;  %v1306_v60 = vsub.f32 %v1212_v47, %v1300_v58 }
 0x261   :  { %v1310_v61 = vmul.f32 1.442695, %v1305_v59  ;;  %v1312_v62 = vmul.f32 1.442695, %v1306_v60 }
 0x262   :  { %v1303_v63 = vpop.xlane.xlu1 %1302 }
 0x263   :  { %2190 = vpow2.f32 %v1310_v61  ;;  %v1307_v1 = vsub.f32 %v1288_v48, %v1303_v63 }
 0x264   :  { %2192 = vpow2.f32 %v1312_v62 }
 0x265   :  { %v1314_v2 = vmul.f32 1.442695, %v1307_v1 }
 0x267   :  { %2194 = vpow2.f32 %v1314_v2 }
 0x26c   :  { %v2189_v3 = vpop.eup %2188 }
 0x26d   :  { %v1316_v4 = vsel %vm987_vm2, %v2189_v3, 0.0 }
 0x26e   :  { %1317 = vadd.xlane.f32.xlu0 %v1316_v4 }
 0x270   :  { %v2191_v5 = vpop.eup %2190 }
 0x271   :  { %v2193_v6 = vpop.eup %2192  ;;  %v1319_v7 = vsel %vm987_vm2, %v2191_v5, 0.0 }
 0x272   :  { %1320 = vadd.xlane.f32.xlu1 %v1319_v7  ;;  %v1322_v8 = vsel %vm987_vm2, %v2193_v6, 0.0 }
 0x273   :  { %1323 = vadd.xlane.f32.xlu0 %v1322_v8 }
 0x274   :  { %v2195_v9 = vpop.eup %2194 }
 0x275   :  { %v1325_v10 = vsel %vm987_vm2, %v2195_v9, 0.0 }
 0x276   :  { %1326 = vadd.xlane.f32.xlu1 %v1325_v10 }
 0x2f7   :  { %v1318_v11 = vpop.xlane.xlu0 %1317 }
 0x2f8   :  { %2196 = vrcp.f32 %v1318_v11 }
 0x2fb   :  { %v1321_v12 = vpop.xlane.xlu1 %1320 }
 0x2fc   :  { %v1324_v13 = vpop.xlane.xlu0 %1323  ;;  %2198 = vrcp.f32 %v1321_v12 }
 0x2fd   :  { %2200 = vrcp.f32 %v1324_v13 }
 0x2ff   :  { %v1327_v14 = vpop.xlane.xlu1 %1326 }
 0x300   :  { %2202 = vrcp.f32 %v1327_v14 }
 0x305   :  { %v2197_v15 = vpop.eup %2196 }
 0x306   :  { %v1329_v16 = vmul.f32 %v2197_v15, %v2189_v3 }
 0x308   :  { %2140 = vmatmul.mubr.msk.f32.vlgmr.msra.gmra.mxu0 %vm987_vm2, %v1329_v16  ;;  %1336 = vst.msk [vmem:[#allocation12] sm:$0xff] %vm987_vm2, %v1329_v16 }
 0x309   :  { %v2199_v17 = vpop.eup %2198  ;;  %2148 = vmatpush3.msra.mxu0 %v906_v38  ;;  %2149 = vmatprep.mubr.msk.f32.mxu0 %vm2362_vm0, %v2361_v0 }
 0x30a   :  { %v2201_v18 = vpop.eup %2200  ;;  %v1331_v19 = vmul.f32 %v2199_v17, %v2191_v5  ;;  %2157 = vmatprep.subr.mxu0 %v2361_v0 }
 0x30b   :  { %v1333_v20 = vmul.f32 %v2201_v18, %v2193_v6 }
 0x30c   :  { %2145 = vmatmul.mubr.msk.f32.vlgmr.msra.gmra.mxu1 %vm987_vm2, %v1331_v19  ;;  %1337 = vst.msk [vmem:[#allocation12 + $0x8] sm:$0xff] %vm987_vm2, %v1331_v19 }
 0x30d   :  { %v2203_v21 = vpop.eup %2202  ;;  %2150 = vmatmul.mubr.msk.f32.vlgmr.msra.gmra.mxu0 %vm987_vm2, %v1333_v20  ;;  %1338 = vst.msk [vmem:[#allocation12 + $0x10] sm:$0xff] %vm987_vm2, %v1333_v20  ;;  %2153 = vmatpush3.msra.mxu1 %v2515_v39 }
 0x30e   :  { %2154 = vmatprep.mubr.msk.f32.mxu1 %vm2362_vm0, %v2361_v0  ;;  %v1335_v22 = vmul.f32 %v2203_v21, %v2195_v9  ;;  %2159 = vmatprep.mubr.msk.f32.mxu0 %vm2362_vm0, %v2361_v0 }
 0x30f   :  { %2162 = vmatprep.subr.mxu1 %v2361_v0  ;;  %2158 = vmatpush3.msra.mxu0 %v1632_v23 }
 0x310   :  { %2155 = vmatmul.mubr.msk.f32.vlgmr.msra.gmra.mxu1 %vm987_vm2, %v1335_v22  ;;  %1339 = vst.msk [vmem:[#allocation12 + $0x18] sm:$0xff] %vm987_vm2, %v1335_v22  ;;  %2167 = vmatprep.subr.mxu0 %v2361_v0 }
 0x311   :  { %2164 = vmatprep.mubr.msk.f32.mxu1 %vm2362_vm0, %v2361_v0  ;;  %2163 = vmatpush3.msra.mxu1 %v1633_v24 }
 0x312   :  { %2172 = vmatprep.subr.mxu1 %v2361_v0 }
 0x3c8   :  { %v1409_v26 = vpop.f32.mrf.mxu0 }
 0x3c9   :  { %2160 = vmatmul.mubr.msk.f32.vlgmr.msra.gmra.mxu0 %vm987_vm2, %v1409_v26 }
 0x3ca   :  { %v2141_v27 = vpop.f32.mrf.mxu0  ;;  %2168 = vmatpush3.msra.mxu0 %v1634_v25  ;;  %2169 = vmatprep.mubr.msk.f32.mxu0 %vm2362_vm0, %v2361_v0 }
 0x3cc   :  { %v1482_v29 = vpop.f32.mrf.mxu1 }
 0x3cd   :  { %v1555_v30 = vpop.f32.mrf.mxu0  ;;  %2165 = vmatmul.mubr.msk.f32.vlgmr.msra.gmra.mxu1 %vm987_vm2, %v1482_v29 }
 0x3ce   :  { %2170 = vmatmul.mubr.msk.f32.vlgmr.msra.gmra.mxu0 %vm987_vm2, %v1555_v30  ;;  %v2146_v31 = vpop.f32.mrf.mxu1  ;;  %2173 = vmatpush3.msra.mxu1 %v1635_v28 }
 0x3cf   :  { %v2151_v32 = vpop.f32.mrf.mxu0  ;;  %2174 = vmatprep.mubr.msk.f32.mxu1 %vm2362_vm0, %v2361_v0 }
 0x3d0   :  { %v1628_v33 = vpop.f32.mrf.mxu1 }
 0x3d1   :  { %2175 = vmatmul.mubr.msk.f32.vlgmr.msra.gmra.mxu1 %vm987_vm2, %v1628_v33 }
 0x3d2   :  { %v2156_v34 = vpop.f32.mrf.mxu1 }
 0x3d3   :  { %2315 = shalt.err (!%p2312_p1)
}
 0x3d4   :  { %1957 = dma.vmem_to_hbm [thread:$0]  %s1952_s4, 512, %s2574_s6, [#allocation13], %s2355_s24, %s2355_s24, %s2356_s25  }
 0x3d5   :  { %s2364_s26 = smov [#allocation11]  }
 0x3d6   :  { %s1942_s27 = sshll.u32 %s2364_s26, 4  ;;  %s1943_s27 = int_to_ptr.vmem [resolvable:$true] %s1942_s27 }
 0x3d7   :  { %s2324_s6 = scalar_lea.vmem %s1943_s27, 128  ;;  %p2329_p3 = scmp.lt.s32.totalorder %s1943_s27, %s1943_s27 }
 0x3d8   :  { %p2325_p2 = scmp.ne.s32.totalorder %s1943_s27, %s2324_s6  ;;  %p2330_p4 = scmp.lt.s32.totalorder %s2324_s6, %s2324_s6 }
 0x3da   :  { %p2331_p5 = por %p2330_p4, %p2329_p3 }
 0x3dc   :  { %p2332_p6 = pnand %p2331_p5, %p2325_p2 }
 0x489   :  { %v1705_v0 = vpop.f32.mrf.mxu0 }
 0x48a   :  { %v1928_v37 = vsel %vm95_vm1, %v1705_v0, 0.0 }
 0x48b   :  { %v2161_v35 = vpop.f32.mrf.mxu0 }
 0x48d   :  { %v1778_v36 = vpop.f32.mrf.mxu1 }
 0x48e   :  { %v1929_v38 = vsel %vm95_vm1, %v1778_v36, 0.0  ;;  %v1851_v39 = vpop.f32.mrf.mxu0 }
 0x48f   :  { %v1930_v40 = vadd.f32 %v1929_v38, %v1928_v37  ;;  %v2166_v41 = vpop.f32.mrf.mxu1  ;;  %v1931_v42 = vsel %vm95_vm1, %v1851_v39, 0.0 }
 0x490   :  { %v2171_v43 = vpop.f32.mrf.mxu0 }
 0x491   :  { %v1932_v44 = vadd.f32 %v1931_v42, %v1930_v40  ;;  %v1924_v45 = vpop.f32.mrf.mxu1 }
 0x492   :  { %v1933_v46 = vsel %vm95_vm1, %v1924_v45, 0.0 }
 0x493   :  { %v1934_v47 = vadd.f32 %v1933_v46, %v1932_v44  ;;  %v2176_v48 = vpop.f32.mrf.mxu1 }
 0x495   :  { %1935 = vst.msk [vmem:[#allocation11] sm:$0xff] %vm95_vm1, %v1934_v47 }
 0x496   :  { %2335 = shalt.err (!%p2332_p6)
}
 0x497   :  { %1945 = dma.vmem_to_hbm [thread:$0]  %s1943_s27, 128, %s2573_s5, [#allocation4]  }
 0x498   :  { %2350 = dma.done.wait [#allocation4], 128  }
 0x499   :  { %2351 = vsyncadd [#allocation4], 4294967168 }
 0x49a   :  { %2352 = dma.done.wait [#allocation13], 512  }
 0x49b   :  { %2353 = vsyncadd [#allocation13], 4294966784 }
 0x49c   :  { %1964 = vsyncpa [#allocation3], 1 }
 0x49d   :  { %1965 = vsyncpa [#allocation6], 1 }
 0x49e   :  { %1966 = vsyncpa [#allocation9], 1 }
 0x49f   :  { %1967 = vsyncpa [#allocation4], 1 }
 0x4a0   :  { %1968 = vsyncpa [#allocation13], 1 }

</bundles_post_ra>
